<compile_context>
chip_gen: v6e
topology: v6e:2x2x1
jax: 0.10.0
libtpu: 0.0.40
codegen_flags: <defaults>
</compile_context>

<pallas_src>
import math

import jax
import jax.numpy as jnp
from jax.experimental import pallas as pl
from jax.experimental.pallas import tpu as pltpu


def _copy_kernel(x_ref, o_ref):
    # Pure lane-dense copy; shapes of x_ref and o_ref match exactly.
    o_ref[...] = x_ref[...]


def _pallas_copy_2d(x2):
    """Copy a 2-D (rows, C) array through a tiled Pallas kernel."""
    R, C = x2.shape
    itemsize = x2.dtype.itemsize

    # ~2 MiB per block. With input+output each double-buffered that is
    # ~8 MiB of VMEM -> fits v5e's 16 MiB default scoped limit and leaves
    # plenty of headroom on v6e (32/128 MiB) and v7x (32/64 MiB).
    target_bytes = 2 * 1024 * 1024
    rows_budget = max(8, target_bytes // max(1, C * itemsize))
    if R <= rows_budget:
        tn = R  # full extent along rows (satisfies the (8,128) block rule)
    else:
        tn = max(8, (rows_budget // 8) * 8)  # multiple of 8 sublanes

    grid = (pl.cdiv(R, tn),)

    return pl.pallas_call(
        _copy_kernel,
        out_shape=jax.ShapeDtypeStruct((R, C), x2.dtype),
        grid=grid,
        in_specs=[pl.BlockSpec((tn, C), lambda i: (i, 0))],
        out_specs=pl.BlockSpec((tn, C), lambda i: (i, 0)),
        compiler_params=pltpu.CompilerParams(
            dimension_semantics=("parallel",)),
        cost_estimate=pl.CostEstimate(
            flops=0,
            transcendentals=0,
            bytes_accessed=2 * R * C * itemsize),
    )(x2)


def squeeze_last_two(x):
    """Equivalent of torch.squeeze(torch.squeeze(x, dim=-1), dim=-1)."""
    out_shape = tuple(x.shape)
    # torch.squeeze(dim=-1) only removes the dim if its size is 1.
    if len(out_shape) >= 1 and out_shape[-1] == 1:
        out_shape = out_shape[:-1]
    if len(out_shape) >= 1 and out_shape[-1] == 1:
        out_shape = out_shape[:-1]

    if out_shape == tuple(x.shape):
        # No trailing unit dims -> squeeze is a no-op (torch returns a view).
        return x

    # Dropping trailing size-1 dims is a pure metadata reshape in XLA.
    x_sq = x.reshape(out_shape)

    total = math.prod(out_shape) if out_shape else 1
    if len(out_shape) == 0 or total < 8 * 128:
        # Far below one (8,128) VMEM tile: kernel launch overhead dwarfs the
        # copy; the reshape alone is exact and strictly faster.
        return x_sq

    # Present a lane-dense 2-D slab (leading dims flattened, channels last)
    # to the Pallas copy kernel, then restore the squeezed shape (both
    # reshapes are free metadata ops).
    last = out_shape[-1]
    lead = total // last
    y2 = _pallas_copy_2d(x_sq.reshape(lead, last))
    return y2.reshape(out_shape)


if __name__ == "__main__":
    key = jax.random.PRNGKey(0)

    # Main path: pooled feature map (N, C, 1, 1) -> (N, C), exercises the
    # Pallas copy kernel (8*256 = 2048 elements >= one (8,128) tile).
    x = jax.random.normal(key, (8, 256, 1, 1), dtype=jnp.float32)
    out = jax.block_until_ready(squeeze_last_two(x))
    ref = jnp.squeeze(jnp.squeeze(x, axis=-1), axis=-1)
    assert out.shape == (8, 256), out.shape
    assert out.dtype == x.dtype, out.dtype
    assert bool(jnp.array_equal(out, ref)), "mismatch vs reference (kernel path)"

    # Tiny path: (2, 4, 1, 1) -> (2, 4) via the free reshape fast path.
    k1, _ = jax.random.split(key)
    x_tiny = jax.random.normal(k1, (2, 4, 1, 1), dtype=jnp.float32)
    out_tiny = jax.block_until_ready(squeeze_last_two(x_tiny))
    ref_tiny = jnp.squeeze(jnp.squeeze(x_tiny, axis=-1), axis=-1)
    assert out_tiny.shape == (2, 4), out_tiny.shape
    assert bool(jnp.array_equal(out_tiny, ref_tiny)), "mismatch vs reference (tiny path)"

    # No-op path: trailing dims are not size 1 -> squeeze returns input as-is.
    k2, _ = jax.random.split(k1)
    x_noop = jax.random.normal(k2, (2, 4, 16, 16), dtype=jnp.float32)
    out_noop = jax.block_until_ready(squeeze_last_two(x_noop))
    assert out_noop.shape == (2, 4, 16, 16), out_noop.shape
    assert bool(jnp.array_equal(out_noop, x_noop)), "mismatch vs reference (no-op path)"

    print("KERNEL_OK")
</pallas_src>

<mosaic_0001>
module attributes {stable_mosaic.version = 11 : i64} {
  func.func @_copy_kernel(%arg0: i32, %arg1: memref<8x256xf32, #tpu.memory_space<vmem>>, %arg2: memref<8x256xf32, #tpu.memory_space<vmem>>) attributes {dimension_semantics = [#tpu.dimension_semantics<parallel>], iteration_bounds = array<i64: 1>, scalar_prefetch = 0 : i64, scratch_operands = 0 : i64, tpu.core_type = #tpu.core_type<tc>, window_params = [{transform_indices = @transform_0, window_bounds = array<i64: 8, 256>}, {transform_indices = @transform_1, window_bounds = array<i64: 8, 256>}]} {
    %c0 = arith.constant 0 : index
    %c0_0 = arith.constant 0 : index
    %0 = vector.load %arg1[%c0, %c0_0] : memref<8x256xf32, #tpu.memory_space<vmem>>, vector<8x256xf32>
    %c0_1 = arith.constant 0 : index
    %c0_2 = arith.constant 0 : index
    %1 = vector.load %arg2[%c0_1, %c0_2] : memref<8x256xf32, #tpu.memory_space<vmem>>, vector<8x256xf32>
    tpu.vector_store %arg2[%c0_1, %c0_2], %0 {strides = array<i32>} : memref<8x256xf32, #tpu.memory_space<vmem>>, vector<8x256xf32>,
    return
  }
  func.func @transform_0(%arg0: i32) -> (i32, i32) {
    %c0_i32 = arith.constant 0 : i32
    %c0_i32_0 = arith.constant 0 : i32
    return %arg0, %c0_i32 : i32, i32
  }
  func.func @transform_1(%arg0: i32) -> (i32, i32) {
    %c0_i32 = arith.constant 0 : i32
    %c0_i32_0 = arith.constant 0 : i32
    return %arg0, %c0_i32 : i32, i32
  }
}

</mosaic_0001>

<bundles_post_ra>
// kernel: tpu_custom_call.1
= control target key start
LH: loop header
LB: loop body
LE: loop exit
PB: predicated region body
PF: predicated region fallthrough
CT: control target
= control target key end

     0   :  { %6 = vsyncpa [#allocation3], 0  ;;  %s104_s0 = inlined_call_operand.hbm [shape: f32[8,256], index: 0, kind: input, shape index: {}]   ;;  %s105_s1 = inlined_call_operand.hbm [shape: f32[8,256], index: 1, kind: output, shape index: {}]  }
   0x1   :  { %7 = vsyncpa [#allocation4], 0  ;;  %s86_s6 = smov [#allocation2]  }
   0x2   :  { %s14_s7 = sshll.u32 %s86_s6, 4  ;;  %s15_s7 = int_to_ptr.vmem [resolvable:$true] %s14_s7 }
   0x3   :  { %s50_s8 = scalar_lea.vmem %s15_s7, 256  ;;  %p55_p1 = scmp.lt.s32.totalorder %s15_s7, %s15_s7 }
   0x4   :  { %p51_p0 = scmp.ne.s32.totalorder %s15_s7, %s50_s8  ;;  %p56_p2 = scmp.lt.s32.totalorder %s50_s8, %s50_s8 }
   0x6   :  { %p57_p3 = por %p56_p2, %p55_p1 }
   0x8   :  { %p58_p4 = pnand %p57_p3, %p51_p0 }
   0xa   :  { %61 = shalt.err (!%p58_p4)
}
   0xb   :  { %17 = dma.hbm_to_vmem [thread:$0]  %s104_s0, 256, %s15_s7, [#allocation3]  }
   0xc   :  { %82 = dma.done.wait [#allocation3], 256  }
   0xd   :  { %83 = vsyncadd [#allocation3], 4294967040  ;;  %s87_s11 = smov [#allocation5]   ;;  %v21_v0 = vld [vmem:[#allocation2] sm:$0xff]  ;;  %v22_v1 = vld [vmem:[#allocation2 + $0x8] sm:$0xff] }
   0xe   :  { %s31_s12 = sshll.u32 %s87_s11, 4  ;;  %23 = vst [vmem:[#allocation5] sm:$0xff] %v21_v0  ;;  %24 = vst [vmem:[#allocation5 + $0x8] sm:$0xff] %v22_v1  ;;  %s32_s12 = int_to_ptr.vmem [resolvable:$true] %s31_s12 }
   0xf   :  { %s62_s13 = scalar_lea.vmem %s32_s12, 256  ;;  %p67_p6 = scmp.lt.s32.totalorder %s32_s12, %s32_s12 }
  0x10   :  { %p63_p5 = scmp.ne.s32.totalorder %s32_s12, %s62_s13  ;;  %p68_p7 = scmp.lt.s32.totalorder %s62_s13, %s62_s13 }
  0x12   :  { %p69_p8 = por %p68_p7, %p67_p6 }
  0x14   :  { %p70_p9 = pnand %p69_p8, %p63_p5 }
  0x16   :  { %73 = shalt.err (!%p70_p9)
}
  0x17   :  { %34 = dma.vmem_to_hbm [thread:$0]  %s32_s12, 256, %s105_s1, [#allocation4]  }
  0x18   :  { %84 = dma.done.wait [#allocation4], 256  }
  0x19   :  { %85 = vsyncadd [#allocation4], 4294967040 }
  0x1a   :  { %38 = vsyncpa [#allocation3], 1 }
  0x1b   :  { %39 = vsyncpa [#allocation4], 1 }

</bundles_post_ra>
